<compile_context>
chip_gen: v5e
topology: v5e:2x2
jax: 0.10.0
libtpu: 0.0.40
codegen_flags: <defaults>
</compile_context>

<pallas_src>
import jax
import jax.numpy as jnp
from jax.experimental import pallas as pl
from jax.experimental.pallas import tpu as pltpu


def _gcn_encoder_kernel(x_ref, a_ref, w_ref, b_ref, o_ref):
    """x_ref: (B*L, C) f32, a_ref: (B*L, B*L) f32 block-diag adjacency,
    w_ref: (C, D) f32, b_ref: (1, D) f32, o_ref: (B*L, D) f32."""
    # 1) feature mix for the whole batch in one MXU pass (f32 accumulation).
    h = jnp.dot(x_ref[...], w_ref[...], preferred_element_type=jnp.float32)
    # 2) neighborhood aggregation via the block-diagonal adjacency: one
    #    (B*L, B*L) @ (B*L, D) MXU pass, output already in (B*L, D) layout.
    y = jnp.dot(a_ref[...], h, preferred_element_type=jnp.float32)
    # 3) bias + ReLU epilogue, all f32 (no bf16 elementwise -> v5e safe).
    o_ref[...] = jnp.maximum(y + b_ref[...], 0.0)


@jax.jit
def encoder_layer_forward(x, a_hat, w, b):
    """x: (B, L, C) f32, a_hat: (L, L), w: (C, D), b: (D,) -> (B, L, D) f32."""
    B, L, C = x.shape
    D = w.shape[-1]
    # Layout plumbing (all free or tiny, fused inside this one jit):
    #   * contiguous reshape of x to the (B*L, C) slab,
    #   * block-diagonal adjacency A_blk = kron(I_B, A_hat),
    #   * bias as a (1, D) row for in-kernel broadcast.
    x_flat = x.reshape(B * L, C).astype(jnp.float32)
    a_blk = jnp.kron(jnp.eye(B, dtype=jnp.float32), a_hat.astype(jnp.float32))
    w_f32 = w.astype(jnp.float32)
    b_row = b.reshape(1, D).astype(jnp.float32)

    vmem = pl.BlockSpec(memory_space=pltpu.MemorySpace.VMEM)
    y_flat = pl.pallas_call(
        _gcn_encoder_kernel,
        out_shape=jax.ShapeDtypeStruct((B * L, D), jnp.float32),
        in_specs=[vmem, vmem, vmem, vmem],
        out_specs=vmem,
    )(x_flat, a_blk, w_f32, b_row)

    # (B*L, D) -> (B, L, D) is a contiguous reshape: pure metadata, no transpose.
    return y_flat.reshape(B, L, D)


def make_params(key, L, C, D):
    """Deterministic synthetic parameters for the wrapped gcn_layer."""
    k_adj, k_w, k_b = jax.random.split(key, 3)
    # Symmetric random adjacency, canonical A + I, symmetric normalization:
    # A_hat = Deg^-1/2 (A + I) Deg^-1/2
    raw = jax.random.uniform(k_adj, (L, L), dtype=jnp.float32)
    sym = (raw + raw.T) * 0.5
    eye = jnp.eye(L, dtype=jnp.float32)
    adj = (sym > 0.5).astype(jnp.float32)
    adj = adj * (1.0 - eye) + eye          # zero the diag first -> diag exactly 1
    deg = jnp.sum(adj, axis=-1)
    d_inv_sqrt = 1.0 / jnp.sqrt(deg)
    a_hat = adj * d_inv_sqrt[:, None] * d_inv_sqrt[None, :]
    w = jax.random.normal(k_w, (C, D), dtype=jnp.float32) * (1.0 / jnp.sqrt(C))
    b = jax.random.normal(k_b, (D,), dtype=jnp.float32) * 0.01
    return a_hat, w, b


def reference_forward(x, a_hat, w, b):
    """Pure-f32 JAX reference of the canonical GCN layer: ReLU(A x W + b)."""
    h = jnp.einsum("blc,cd->bld", x, w)
    y = jnp.einsum("lm,bmd->bld", a_hat, h)
    return jnp.maximum(y + b.reshape(1, 1, -1), 0.0)


if __name__ == "__main__":
    B, L, C, D = 2, 8, 32, 32   # (batch, nodes, in_channels, d_ff)
    key = jax.random.PRNGKey(0)
    k_x, k_p = jax.random.split(key)
    x = jax.random.normal(k_x, (B, L, C), dtype=jnp.float32)
    a_hat, w, b = make_params(k_p, L, C, D)

    y = jax.block_until_ready(encoder_layer_forward(x, a_hat, w, b))
    y_ref = reference_forward(x, a_hat, w, b)

    assert y.shape == (B, L, D)
    # Tolerance covers MXU default-precision (bf16-pass) rounding of f32 dots
    # relative to the full-f32 reference; errors here are O(1e-2) worst case.
    assert jnp.allclose(y, y_ref, atol=3e-2, rtol=3e-2), float(
        jnp.max(jnp.abs(y - y_ref))
    )

    print("KERNEL_OK")
</pallas_src>

<mosaic_0001>
module attributes {stable_mosaic.version = 11 : i64} {
  func.func @_gcn_encoder_kernel(%arg0: memref<16x32xf32, #tpu.memory_space<vmem>>, %arg1: memref<16x16xf32, #tpu.memory_space<vmem>>, %arg2: memref<32x32xf32, #tpu.memory_space<vmem>>, %arg3: memref<1x32xf32, #tpu.memory_space<vmem>>, %arg4: memref<16x32xf32, #tpu.memory_space<vmem>>) attributes {dimension_semantics = [], scalar_prefetch = 0 : i64, scratch_operands = 0 : i64, tpu.core_type = #tpu.core_type<tc>} {
    %c0 = arith.constant 0 : index
    %c0_0 = arith.constant 0 : index
    %0 = vector.load %arg0[%c0, %c0_0] : memref<16x32xf32, #tpu.memory_space<vmem>>, vector<16x32xf32>
    %c0_1 = arith.constant 0 : index
    %c0_2 = arith.constant 0 : index
    %1 = vector.load %arg2[%c0_1, %c0_2] : memref<32x32xf32, #tpu.memory_space<vmem>>, vector<32x32xf32>
    %cst = arith.constant dense<0.000000e+00> : vector<16x32xf32>
    %2 = tpu.matmul %0, %1, %cst {dimension_numbers = #tpu.dot_dimension_numbers<[1], [0], [0], [1], [0, 0, 1, 1], [], []>} : vector<16x32xf32>, vector<32x32xf32>, vector<16x32xf32> -> vector<16x32xf32>
    %c0_3 = arith.constant 0 : index
    %c0_4 = arith.constant 0 : index
    %3 = vector.load %arg1[%c0_3, %c0_4] : memref<16x16xf32, #tpu.memory_space<vmem>>, vector<16x16xf32>
    %cst_5 = arith.constant dense<0.000000e+00> : vector<16x32xf32>
    %4 = tpu.matmul %3, %2, %cst_5 {dimension_numbers = #tpu.dot_dimension_numbers<[1], [0], [0], [1], [0, 0, 1, 1], [], []>} : vector<16x16xf32>, vector<16x32xf32>, vector<16x32xf32> -> vector<16x32xf32>
    %c0_6 = arith.constant 0 : index
    %c0_7 = arith.constant 0 : index
    %5 = vector.load %arg3[%c0_6, %c0_7] : memref<1x32xf32, #tpu.memory_space<vmem>>, vector<1x32xf32>
    %6 = vector.broadcast %5 : vector<1x32xf32> to vector<16x32xf32>
    %7 = arith.addf %4, %6 : vector<16x32xf32>
    %cst_8 = arith.constant 0.000000e+00 : f32
    %8 = vector.broadcast %cst_8 : f32 to vector<16x32xf32>
    %9 = arith.maximumf %7, %8 : vector<16x32xf32>
    %c0_9 = arith.constant 0 : index
    %c0_10 = arith.constant 0 : index
    %10 = vector.load %arg4[%c0_9, %c0_10] : memref<16x32xf32, #tpu.memory_space<vmem>>, vector<16x32xf32>
    tpu.vector_store %arg4[%c0_9, %c0_10], %9 {strides = array<i32>} : memref<16x32xf32, #tpu.memory_space<vmem>>, vector<16x32xf32>,
    return
  }
}

</mosaic_0001>

<bundles_post_ra>
// kernel: encoder_layer_forward.1
= control target key start
LH: loop header
LB: loop body
LE: loop exit
PB: predicated region body
PF: predicated region fallthrough
CT: control target
= control target key end

     0   :  { %s214_s0 = inlined_call_operand.vmem [shape: f32[16,32], index: 0, kind: input, shape index: {}]   ;;  %s215_s1 = inlined_call_operand.vmem [shape: f32[16,16], index: 1, kind: input, shape index: {}]   ;;  %s216_s2 = inlined_call_operand.vmem [shape: f32[32,32], index: 2, kind: input, shape index: {}]   ;;  %s217_s3 = inlined_call_operand.vmem [shape: f32[1,32], index: 3, kind: input, shape index: {}]   ;;  %s218_s4 = inlined_call_operand.hbm [shape: f32[16,32], index: 4, kind: output, shape index: {}]  }
   0x1   :  { %v23_v0 = vld [vmem:[%s216_s2 + $0x18] sm:$0xff]  ;;  %v22_v1 = vld [vmem:[%s216_s2 + $0x10] sm:$0xff]  ;;  %v21_v2 = vld [vmem:[%s216_s2 + $0x8] sm:$0xff] }
   0x2   :  { %116 = vmatpush.msra.mxu2 %v23_v0  ;;  %43 = vmatpush.msra.mxu0 %v23_v0 }
   0x3   :  { %9 = vsyncpa [#allocation3], 0  ;;  %v20_v3 = vld [vmem:[%s216_s2] sm:$0xff]  ;;  %v19_v4 = vld [vmem:[%s214_s0 + $0x8] sm:$0xff]  ;;  %vm24_vm0 = vcmask 261120   ;;  %vm60_vm1 = vcmask 130048  }
   0x4   :  { %117 = vmatpush.msra.mxu2 %v22_v1  ;;  %44 = vmatpush.msra.mxu0 %v22_v1  ;;  %v18_v5 = vld [vmem:[%s214_s0] sm:$0xff]  ;;  %v55_v8 = vld [vmem:[%s215_s1 + $0x8] sm:$0xff]  ;;  %s152_s5 = smov [#allocation2]   ;;  %s100_s9 = sshll.u32 %s218_s4, 4  ;;  %s101_s9 = int_to_ptr.hbm [resolvable:$true] %s100_s9 }
   0x5   :  { %v54_v9 = vld [vmem:[%s215_s1] sm:$0xff]  ;;  %s98_s6 = sshll.u32 %s152_s5, 4  ;;  %s153_s1 = smov 128   ;;  %s99_s6 = int_to_ptr.vmem [resolvable:$true] %s98_s6 }
   0x6   :  { %118 = vmatpush.msra.mxu2 %v21_v2  ;;  %45 = vmatpush.msra.mxu0 %v21_v2  ;;  %v125_v10 = vld [vmem:[%s217_s3] ss:$0 sm:$0xff]  ;;  %s154_s3 = smov 8  }
   0x8   :  { %119 = vmatpush.msra.mxu2 %v20_v3  ;;  %46 = vmatpush.msra.mxu0 %v20_v3 }
   0x9   :  { %113 = vmatmul.msk.f32.vlgmr.msra.gmra.mxu2 %vm24_vm0, %v19_v4  ;;  %112 = vmatmul.msk.f32.vlgmr.msra.gmra.mxu0 %vm24_vm0, %v18_v5 }
  0x86   :  { %v48_v7 = vpop.f32.mrf.mxu0 }
  0x8c   :  { %v51_v6 = vpop.f32.mrf.mxu2 }
  0x8d   :  { %81 = vmatpush.msra.mxu1 %v51_v6  ;;  %120 = vmatpush.msra.mxu3 %v51_v6 }
  0x8f   :  { %82 = vmatpush.msra.mxu1 %v48_v7  ;;  %121 = vmatpush.msra.mxu3 %v48_v7 }
  0x90   :  { %115 = vmatmul.msk.f32.vlgmr.msra.gmra.mxu3 %vm60_vm1, %v55_v8  ;;  %114 = vmatmul.msk.f32.vlgmr.msra.gmra.mxu1 %vm60_vm1, %v54_v9 }
 0x10d   :  { %v84_v11 = vpop.f32.mrf.mxu1 }
 0x10e   :  { %v85_v12 = vadd.f32 %v125_v10, %v84_v11 }
 0x110   :  { %v90_v13 = vmax.f32 %v85_v12, 0.0 }
 0x112   :  { %92 = vst.msk [vmem:[#allocation2] sm:$0xff] %vm24_vm0, %v90_v13 }
 0x113   :  { %v87_v14 = vpop.f32.mrf.mxu3 }
 0x114   :  { %v88_v15 = vadd.f32 %v125_v10, %v87_v14 }
 0x116   :  { %v91_v16 = vmax.f32 %v88_v15, 0.0 }
 0x118   :  { %93 = vst.msk [vmem:[#allocation2 + $0x8] sm:$0xff] %vm24_vm0, %v91_v16 }
 0x119   :  { %106 = dma.vmem_to_hbm [thread:$0]  %s99_s6, 256, %s101_s9, [#allocation3], %s153_s1, %s153_s1, %s154_s3  }
 0x11a   :  { %150 = dma.done.wait [#allocation3], 256  }
 0x11b   :  { %151 = vsyncadd [#allocation3], 4294967040 }
 0x11c   :  { %111 = vsyncpa [#allocation3], 1 }

</bundles_post_ra>
